<compile_context>
chip_gen: v6e
topology: v6e:2x2x1
jax: 0.10.0
libtpu: 0.0.40
codegen_flags: <defaults>
</compile_context>

<pallas_src>
import functools

import jax
import jax.numpy as jnp
from jax.experimental import pallas as pl
from jax.experimental.pallas import tpu as pltpu

_NEG_PAD = -1e30  # bias for padded label columns; exp() underflows to 0


def _fasttext_kernel(ids_ref, emb_ref, w_ref, b_ref, out_ref, acc_ref, *,
                     inv_seq_len):
    """One (batch_tile, vocab_tile) grid step. grid = (B//bt, V//vt), vocab last."""
    k = pl.program_id(1)

    @pl.when(k == 0)
    def _init():
        acc_ref[...] = jnp.zeros_like(acc_ref)

    ids = ids_ref[...]                        # (Bt, S) int32
    bt, seq_len = ids.shape
    v_tile = emb_ref.shape[0]
    v0 = k * v_tile

    # counts[b, v] = #{ s : ids[b, s] == v0 + v } for this vocab tile.
    # Loop over the (small, static) sequence axis -> only (Bt, Vt) live vregs,
    # no B*S*V one-hot intermediate.
    lane_ids = jax.lax.broadcasted_iota(jnp.int32, (bt, v_tile), 1) + v0
    counts = jnp.zeros((bt, v_tile), jnp.float32)
    for s in range(seq_len):                  # static trip count
        counts = counts + (lane_ids == ids[:, s:s + 1]).astype(jnp.float32)

    # Partial bag-of-words pooling for this vocab tile: (Bt,Vt) @ (Vt,D).
    acc_ref[...] += jnp.dot(counts, emb_ref[...],
                            preferred_element_type=jnp.float32)

    @pl.when(k == pl.num_programs(1) - 1)
    def _finalize():
        pooled = acc_ref[...] * inv_seq_len                     # mean over S
        logits = jnp.dot(pooled, w_ref[...],
                         preferred_element_type=jnp.float32) + b_ref[...]
        # Stable log-softmax over the (padded) label axis; padded columns carry
        # a -1e30 bias so they contribute nothing to max / sum-exp.
        m = jnp.max(logits, axis=-1, keepdims=True)
        shifted = logits - m
        lse = jnp.log(jnp.sum(jnp.exp(shifted), axis=-1, keepdims=True))
        out_ref[...] = shifted - lse


def _round_up(x, m):
    return (x + m - 1) // m * m


def _pick_tile(total, candidates):
    for c in candidates:
        if c <= total and total % c == 0:
            return c
    return total


def fasttext_forward(src_ids, emb_table, linear_w, linear_b, src_lengths=None,
                     *, b_tile=None, v_tile=None):
    """FastText forward: mean-pooled embedding -> linear -> log_softmax.

    src_ids:   [B, S] int32 token ids
    emb_table: [V, D] float32 (padding_idx row already zeroed)
    linear_w:  [L, D] float32
    linear_b:  [L]    float32
    src_lengths is accepted for API parity but unused (torch.mean divides by S).
    """
    del src_lengths
    B, S = src_ids.shape
    V, D = emb_table.shape
    L = linear_w.shape[0]

    if b_tile is None:
        b_tile = _pick_tile(B, (256, 128, 64, 32, 16, 8))
    if v_tile is None:
        v_tile = _pick_tile(V, (1024, 512, 256, 128, 64, 32, 16, 8))
    assert B % b_tile == 0, (B, b_tile)
    assert V % v_tile == 0, (V, v_tile)

    # Lane-dense output: pad the label axis to a multiple of 128. Padded label
    # columns get zero weights and a huge negative bias, then are sliced off.
    Lp = max(128, _round_up(L, 128))
    w_t = jnp.zeros((D, Lp), jnp.float32).at[:, :L].set(
        linear_w.T.astype(jnp.float32))
    b2d = jnp.full((1, Lp), _NEG_PAD, jnp.float32).at[0, :L].set(
        linear_b.astype(jnp.float32))

    grid = (B // b_tile, V // v_tile)
    kernel = functools.partial(_fasttext_kernel, inv_seq_len=1.0 / S)

    out_padded = pl.pallas_call(
        kernel,
        out_shape=jax.ShapeDtypeStruct((B, Lp), jnp.float32),
        grid=grid,
        in_specs=[
            pl.BlockSpec((b_tile, S), lambda i, k: (i, 0)),   # token ids
            pl.BlockSpec((v_tile, D), lambda i, k: (k, 0)),   # emb rows, streamed
            pl.BlockSpec((D, Lp), lambda i, k: (0, 0)),       # linear W^T (padded)
            pl.BlockSpec((1, Lp), lambda i, k: (0, 0)),       # bias (padded)
        ],
        out_specs=pl.BlockSpec((b_tile, Lp), lambda i, k: (i, 0)),
        scratch_shapes=[pltpu.VMEM((b_tile, D), jnp.float32)],  # pooled-sum acc
        compiler_params=pltpu.CompilerParams(
            dimension_semantics=("parallel", "arbitrary"),
            vmem_limit_bytes=32 << 20,  # headroom even on v7x's 64 MiB VMEM
        ),
    )(src_ids.astype(jnp.int32), emb_table.astype(jnp.float32), w_t, b2d)

    return out_padded[:, :L]


def fasttext_reference(src_ids, emb_table, linear_w, linear_b):
    emb = jnp.take(emb_table, src_ids, axis=0)            # (B, S, D)
    mean_emb = jnp.mean(emb, axis=1)                      # (B, D)
    logits = jnp.dot(mean_emb, linear_w.T,
                     precision=jax.lax.Precision.HIGHEST) + linear_b
    return jax.nn.log_softmax(logits, axis=-1)


if __name__ == "__main__":
    # Small shapes consistent with the module's forward; tiles chosen so both
    # grid axes (batch-parallel, vocab-reduction) are exercised.
    B, S = 16, 8          # batch, sequence length
    V, D = 1024, 128      # vocab size, embedding dim
    L = 8                 # label size
    PAD = 1               # pad_token / padding_idx

    key = jax.random.PRNGKey(0)
    k_ids, k_emb, k_w, k_b = jax.random.split(key, 4)

    src_ids = jax.random.randint(k_ids, (B, S), 0, V, dtype=jnp.int32)
    src_lengths = jnp.full((B,), S, jnp.int32)   # accepted but unused by forward

    # nn.Embedding(V, D, padding_idx=PAD): normal init, padding row zeroed.
    emb_table = jax.random.normal(k_emb, (V, D), dtype=jnp.float32)
    emb_table = emb_table.at[PAD].set(0.0)

    # nn.Linear(D, L): deterministic synthetic init.
    linear_w = jax.random.uniform(k_w, (L, D), jnp.float32, -0.1, 0.1)
    linear_b = jax.random.uniform(k_b, (L,), jnp.float32, -0.1, 0.1)

    out = fasttext_forward(src_ids, emb_table, linear_w, linear_b, src_lengths,
                           b_tile=8, v_tile=256)
    out = jax.block_until_ready(out)

    ref = fasttext_reference(src_ids, emb_table, linear_w, linear_b)
    assert out.shape == (B, L)
    assert jnp.allclose(out, ref, atol=1e-5, rtol=1e-5), \
        float(jnp.max(jnp.abs(out - ref)))

    # TODO(synk): batchNLLLoss (training-time NLL + accuracy) is not part of the
    # forward pass and is left to the host-side JAX wrapper.
    print("KERNEL_OK")
</pallas_src>

<mosaic_0001>
module attributes {stable_mosaic.version = 11 : i64} {
  func.func @_fasttext_kernel(%arg0: i32, %arg1: i32, %arg2: memref<8x8xi32, #tpu.memory_space<vmem>>, %arg3: memref<256x128xf32, #tpu.memory_space<vmem>>, %arg4: memref<128x128xf32, #tpu.memory_space<vmem>>, %arg5: memref<1x128xf32, #tpu.memory_space<vmem>>, %arg6: memref<8x128xf32, #tpu.memory_space<vmem>>, %arg7: memref<8x128xf32, #tpu.memory_space<vmem>>) attributes {dimension_semantics = [#tpu.dimension_semantics<parallel>, #tpu.dimension_semantics<arbitrary>], iteration_bounds = array<i64: 2, 4>, scalar_prefetch = 0 : i64, scratch_operands = 1 : i64, tpu.core_type = #tpu.core_type<tc>, window_params = [{transform_indices = @transform_0, window_bounds = array<i64: 8, 8>}, {transform_indices = @transform_1, window_bounds = array<i64: 256, 128>}, {pipeline_mode = #tpu.pipeline_mode<synchronous>, transform_indices = @transform_2, window_bounds = array<i64: 128, 128>}, {pipeline_mode = #tpu.pipeline_mode<synchronous>, transform_indices = @transform_3, window_bounds = array<i64: 1, 128>}, {transform_indices = @transform_4, window_bounds = array<i64: 8, 128>}]} {
    %c0_i32 = arith.constant 0 : i32
    %0 = arith.cmpi eq, %arg1, %c0_i32 : i32
    %1 = arith.extui %0 : i1 to i32
    %c0_i32_0 = arith.constant 0 : i32
    %2 = arith.cmpi ne, %1, %c0_i32_0 : i32
    scf.if %2 {
      %cst_10 = arith.constant 0.000000e+00 : f32
      %65 = vector.broadcast %cst_10 : f32 to vector<8x128xf32>
      %c0_11 = arith.constant 0 : index
      %c0_12 = arith.constant 0 : index
      %66 = vector.load %arg7[%c0_11, %c0_12] : memref<8x128xf32, #tpu.memory_space<vmem>>, vector<8x128xf32>
      tpu.vector_store %arg7[%c0_11, %c0_12], %65 {strides = array<i32>} : memref<8x128xf32, #tpu.memory_space<vmem>>, vector<8x128xf32>,
    } else {
    }
    %c0 = arith.constant 0 : index
    %c0_1 = arith.constant 0 : index
    %3 = vector.load %arg2[%c0, %c0_1] : memref<8x8xi32, #tpu.memory_space<vmem>>, vector<8x8xi32>
    %c256_i32 = arith.constant 256 : i32
    %4 = arith.muli %arg1, %c256_i32 : i32
    %5 = tpu.iota {dimensions = array<i32: 1>} : vector<8x256xi32>
    %6 = vector.broadcast %4 : i32 to vector<8x256xi32>
    %7 = arith.addi %5, %6 : vector<8x256xi32>
    %cst = arith.constant 0.000000e+00 : f32
    %8 = vector.broadcast %cst : f32 to vector<8x256xf32>
    %9 = vector.extract_strided_slice %3 {offsets = [0, 0], sizes = [8, 1], strides = [1, 1]} : vector<8x8xi32> to vector<8x1xi32>
    %10 = vector.broadcast %9 : vector<8x1xi32> to vector<8x256xi32>
    %11 = arith.cmpi eq, %7, %10 : vector<8x256xi32>
    %12 = arith.extui %11 : vector<8x256xi1> to vector<8x256xi32>
    %13 = arith.sitofp %12 : vector<8x256xi32> to vector<8x256xf32>
    %14 = arith.addf %8, %13 : vector<8x256xf32>
    %15 = vector.extract_strided_slice %3 {offsets = [0, 1], sizes = [8, 1], strides = [1, 1]} : vector<8x8xi32> to vector<8x1xi32>
    %16 = vector.broadcast %15 : vector<8x1xi32> to vector<8x256xi32>
    %17 = arith.cmpi eq, %7, %16 : vector<8x256xi32>
    %18 = arith.extui %17 : vector<8x256xi1> to vector<8x256xi32>
    %19 = arith.sitofp %18 : vector<8x256xi32> to vector<8x256xf32>
    %20 = arith.addf %14, %19 : vector<8x256xf32>
    %21 = vector.extract_strided_slice %3 {offsets = [0, 2], sizes = [8, 1], strides = [1, 1]} : vector<8x8xi32> to vector<8x1xi32>
    %22 = vector.broadcast %21 : vector<8x1xi32> to vector<8x256xi32>
    %23 = arith.cmpi eq, %7, %22 : vector<8x256xi32>
    %24 = arith.extui %23 : vector<8x256xi1> to vector<8x256xi32>
    %25 = arith.sitofp %24 : vector<8x256xi32> to vector<8x256xf32>
    %26 = arith.addf %20, %25 : vector<8x256xf32>
    %27 = vector.extract_strided_slice %3 {offsets = [0, 3], sizes = [8, 1], strides = [1, 1]} : vector<8x8xi32> to vector<8x1xi32>
    %28 = vector.broadcast %27 : vector<8x1xi32> to vector<8x256xi32>
    %29 = arith.cmpi eq, %7, %28 : vector<8x256xi32>
    %30 = arith.extui %29 : vector<8x256xi1> to vector<8x256xi32>
    %31 = arith.sitofp %30 : vector<8x256xi32> to vector<8x256xf32>
    %32 = arith.addf %26, %31 : vector<8x256xf32>
    %33 = vector.extract_strided_slice %3 {offsets = [0, 4], sizes = [8, 1], strides = [1, 1]} : vector<8x8xi32> to vector<8x1xi32>
    %34 = vector.broadcast %33 : vector<8x1xi32> to vector<8x256xi32>
    %35 = arith.cmpi eq, %7, %34 : vector<8x256xi32>
    %36 = arith.extui %35 : vector<8x256xi1> to vector<8x256xi32>
    %37 = arith.sitofp %36 : vector<8x256xi32> to vector<8x256xf32>
    %38 = arith.addf %32, %37 : vector<8x256xf32>
    %39 = vector.extract_strided_slice %3 {offsets = [0, 5], sizes = [8, 1], strides = [1, 1]} : vector<8x8xi32> to vector<8x1xi32>
    %40 = vector.broadcast %39 : vector<8x1xi32> to vector<8x256xi32>
    %41 = arith.cmpi eq, %7, %40 : vector<8x256xi32>
    %42 = arith.extui %41 : vector<8x256xi1> to vector<8x256xi32>
    %43 = arith.sitofp %42 : vector<8x256xi32> to vector<8x256xf32>
    %44 = arith.addf %38, %43 : vector<8x256xf32>
    %45 = vector.extract_strided_slice %3 {offsets = [0, 6], sizes = [8, 1], strides = [1, 1]} : vector<8x8xi32> to vector<8x1xi32>
    %46 = vector.broadcast %45 : vector<8x1xi32> to vector<8x256xi32>
    %47 = arith.cmpi eq, %7, %46 : vector<8x256xi32>
    %48 = arith.extui %47 : vector<8x256xi1> to vector<8x256xi32>
    %49 = arith.sitofp %48 : vector<8x256xi32> to vector<8x256xf32>
    %50 = arith.addf %44, %49 : vector<8x256xf32>
    %51 = vector.extract_strided_slice %3 {offsets = [0, 7], sizes = [8, 1], strides = [1, 1]} : vector<8x8xi32> to vector<8x1xi32>
    %52 = vector.broadcast %51 : vector<8x1xi32> to vector<8x256xi32>
    %53 = arith.cmpi eq, %7, %52 : vector<8x256xi32>
    %54 = arith.extui %53 : vector<8x256xi1> to vector<8x256xi32>
    %55 = arith.sitofp %54 : vector<8x256xi32> to vector<8x256xf32>
    %56 = arith.addf %50, %55 : vector<8x256xf32>
    %c0_2 = arith.constant 0 : index
    %c0_3 = arith.constant 0 : index
    %57 = vector.load %arg7[%c0_2, %c0_3] : memref<8x128xf32, #tpu.memory_space<vmem>>, vector<8x128xf32>
    %c0_4 = arith.constant 0 : index
    %c0_5 = arith.constant 0 : index
    %58 = vector.load %arg3[%c0_4, %c0_5] : memref<256x128xf32, #tpu.memory_space<vmem>>, vector<256x128xf32>
    %cst_6 = arith.constant dense<0.000000e+00> : vector<8x128xf32>
    %59 = tpu.matmul %56, %58, %cst_6 {dimension_numbers = #tpu.dot_dimension_numbers<[1], [0], [0], [1], [0, 0, 1, 1], [], []>} : vector<8x256xf32>, vector<256x128xf32>, vector<8x128xf32> -> vector<8x128xf32>
    %60 = arith.addf %57, %59 : vector<8x128xf32>
    %c0_7 = arith.constant 0 : index
    %c0_8 = arith.constant 0 : index
    %61 = vector.load %arg7[%c0_7, %c0_8] : memref<8x128xf32, #tpu.memory_space<vmem>>, vector<8x128xf32>
    tpu.vector_store %arg7[%c0_7, %c0_8], %60 {strides = array<i32>} : memref<8x128xf32, #tpu.memory_space<vmem>>, vector<8x128xf32>,
    %c3_i32 = arith.constant 3 : i32
    %62 = arith.cmpi eq, %arg1, %c3_i32 : i32
    %63 = arith.extui %62 : i1 to i32
    %c0_i32_9 = arith.constant 0 : i32
    %64 = arith.cmpi ne, %63, %c0_i32_9 : i32
    scf.if %64 {
      %c0_10 = arith.constant 0 : index
      %c0_11 = arith.constant 0 : index
      %65 = vector.load %arg7[%c0_10, %c0_11] : memref<8x128xf32, #tpu.memory_space<vmem>>, vector<8x128xf32>
      %cst_12 = arith.constant 1.250000e-01 : f32
      %66 = vector.broadcast %cst_12 : f32 to vector<8x128xf32>
      %67 = arith.mulf %65, %66 : vector<8x128xf32>
      %c0_13 = arith.constant 0 : index
      %c0_14 = arith.constant 0 : index
      %68 = vector.load %arg4[%c0_13, %c0_14] : memref<128x128xf32, #tpu.memory_space<vmem>>, vector<128x128xf32>
      %cst_15 = arith.constant dense<0.000000e+00> : vector<8x128xf32>
      %69 = tpu.matmul %67, %68, %cst_15 {dimension_numbers = #tpu.dot_dimension_numbers<[1], [0], [0], [1], [0, 0, 1, 1], [], []>} : vector<8x128xf32>, vector<128x128xf32>, vector<8x128xf32> -> vector<8x128xf32>
      %c0_16 = arith.constant 0 : index
      %c0_17 = arith.constant 0 : index
      %70 = vector.load %arg5[%c0_16, %c0_17] : memref<1x128xf32, #tpu.memory_space<vmem>>, vector<1x128xf32>
      %71 = vector.broadcast %70 : vector<1x128xf32> to vector<8x128xf32>
      %72 = arith.addf %69, %71 : vector<8x128xf32>
      %cst_18 = arith.constant dense<0xFF800000> : vector<8xf32>
      %73 = vector.multi_reduction <maximumf>, %72, %cst_18 [1] : vector<8x128xf32> to vector<8xf32>
      %74 = vector.shape_cast %73 : vector<8xf32> to vector<8x1xf32>
      %75 = vector.broadcast %74 : vector<8x1xf32> to vector<8x128xf32>
      %76 = arith.subf %72, %75 : vector<8x128xf32>
      %77 = math.exp %76 : vector<8x128xf32>
      %cst_19 = arith.constant dense<0.000000e+00> : vector<8xf32>
      %78 = vector.multi_reduction <add>, %77, %cst_19 [1] : vector<8x128xf32> to vector<8xf32>
      %79 = vector.shape_cast %78 : vector<8xf32> to vector<8x1xf32>
      %80 = math.log %79 : vector<8x1xf32>
      %81 = vector.broadcast %80 : vector<8x1xf32> to vector<8x128xf32>
      %82 = arith.subf %76, %81 : vector<8x128xf32>
      %c0_20 = arith.constant 0 : index
      %c0_21 = arith.constant 0 : index
      %83 = vector.load %arg6[%c0_20, %c0_21] : memref<8x128xf32, #tpu.memory_space<vmem>>, vector<8x128xf32>
      tpu.vector_store %arg6[%c0_20, %c0_21], %82 {strides = array<i32>} : memref<8x128xf32, #tpu.memory_space<vmem>>, vector<8x128xf32>,
    } else {
    }
    return
  }
  func.func @transform_0(%arg0: i32, %arg1: i32) -> (i32, i32) {
    %c0_i32 = arith.constant 0 : i32
    %c0_i32_0 = arith.constant 0 : i32
    return %arg0, %c0_i32 : i32, i32
  }
  func.func @transform_1(%arg0: i32, %arg1: i32) -> (i32, i32) {
    %c0_i32 = arith.constant 0 : i32
    %c0_i32_0 = arith.constant 0 : i32
    return %arg1, %c0_i32 : i32, i32
  }
  func.func @transform_2(%arg0: i32, %arg1: i32) -> (i32, i32) {
    %c0_i32 = arith.constant 0 : i32
    %c0_i32_0 = arith.constant 0 : i32
    %c0_i32_1 = arith.constant 0 : i32
    return %c0_i32, %c0_i32_0 : i32, i32
  }
  func.func @transform_3(%arg0: i32, %arg1: i32) -> (i32, i32) {
    %c0_i32 = arith.constant 0 : i32
    %c0_i32_0 = arith.constant 0 : i32
    %c0_i32_1 = arith.constant 0 : i32
    return %c0_i32, %c0_i32_0 : i32, i32
  }
  func.func @transform_4(%arg0: i32, %arg1: i32) -> (i32, i32) {
    %c0_i32 = arith.constant 0 : i32
    %c0_i32_0 = arith.constant 0 : i32
    return %arg0, %c0_i32 : i32, i32
  }
}

</mosaic_0001>

<bundles_post_ra>
// kernel: tpu_custom_call.1
= control target key start
LH: loop header
LB: loop body
LE: loop exit
PB: predicated region body
PF: predicated region fallthrough
CT: control target
= control target key end

     0   :  { %s1443_s0 = inlined_call_operand.vmem [shape: s32[16,8], index: 0, kind: input, shape index: {}]   ;;  %s1444_s1 = inlined_call_operand.hbm [shape: f32[1024,128], index: 1, kind: input, shape index: {}]   ;;  %s1445_s2 = inlined_call_operand.hbm [shape: f32[128,128], index: 2, kind: input, shape index: {}]   ;;  %s1446_s3 = inlined_call_operand.vmem [shape: f32[1,128], index: 3, kind: input, shape index: {}]   ;;  %s1447_s4 = inlined_call_operand.hbm [shape: f32[16,128], index: 4, kind: output, shape index: {}]  }
   0x1   :  { %1458 = sst [smem:[#allocation17_spill]] %s1445_s2 }
   0x2   :  { %1459 = sst [smem:[#allocation18_spill]] %s1447_s4 }
   0x3   :  { %9 = vsyncpa [#allocation4], 0 }
   0x4   :  { %11 = vsyncpa [#allocation4 + $0x1], 0 }
   0x5   :  { %12 = vsyncpa [#allocation7], 0 }
   0x6   :  { %13 = vsyncpa [#allocation5], 0 }
   0x7   :  { %15 = vsyncpa [#allocation5 + $0x1], 0  ;;  %s1181_s15 = smov 0   ;;  %s1183_s16 = smov 0  }
   0x8   :  { %s1185_s17 = smov 0   ;;  %s1187_s18 = smov 0  }
   0x9   :  { %s1189_s19 = smov 0   ;;  %s1191_s20 = smov 0  }
   0xa   :  { %s1193_s21 = smov 0   ;;  %s1195_s22 = smov 0  }
   0xb   :  { %s1197_s23 = smov 0   ;;  %s1199_s24 = smov 0  }
   0xc   :  { %s1201_s25 = smov 0  }
   0xd LB: > { %1460 = sst [smem:[#allocation12_spill]] %s1097_s15  ;;  %s694_s26 = sadd.s32 4294967295, %s1137_s25   ;;  %s1137_s25 = sphi %s1201_s25, %s21_s25   ;;  %s1133_s24 = sphi %s1199_s24, %s1493_s24   ;;  %s1129_s23 = sphi %s1197_s23, %s1492_s23   ;;  %s1125_s22 = sphi %s1195_s22, %s1491_s22   ;;  %s1121_s21 = sphi %s1193_s21, %s1490_s21   ;;  %s1117_s20 = sphi %s1191_s20, %s1489_s20   ;;  %s1113_s19 = sphi %s1189_s19, %s1488_s19   ;;  %s1109_s18 = sphi %s1187_s18, %s1487_s18   ;;  %s1105_s17 = sphi %s1185_s17, %s1486_s17   ;;  %s1101_s16 = sphi %s1183_s16, %s1485_s16   ;;  %s1097_s15 = sphi %s1181_s15, %s1484_s15  }
   0xe   : > { %1461 = sst [smem:[#allocation13_spill]] %s1137_s25  ;;  %s695_s27 = sadd.s32 4294967294, %s1137_s25  }
   0xf   : > { %p79_p0 = scmp.ne.s32.totalorder %s1113_s19, %s1109_s18  ;;  %p1237_p1 = scmp.eq.s32.totalorder %s694_s26, 0 }
  0x10   : > { %s134_s29 = sadd.s32 1, %s1105_s17  ;;  %p144_p2 = scmp.ne.s32.totalorder %s1105_s17, %s1101_s16 }
  0x11   : > { %p1246_p3 = por %p1237_p1, %p79_p0  ;;  %p145_p4 = scmp.eq.s32.totalorder %s694_s26, 7 }
  0x12   : > { %p150_p5 = scmp.ne.s32.totalorder %s1101_s16, %s1097_s15  ;;  %p151_p6 = scmp.eq.s32.totalorder %s695_s27, 7 }
  0x13   : > { %p1252_p7 = por %p145_p4, %p144_p2  ;;  %p696_p8 = scmp.ge.s32.totalorder %s1137_s25, 1 }
  0x14   : > { %p1257_p9 = por %p151_p6, %p150_p5  ;;  %p158_p10 = scmp.lt.s32.totalorder %s1137_s25, 9 }
  0x15   : > { %s1464_s5 = scalar_select %p1252_p7, 1, 0 }
  0x16   : > { %s1465_s6 = scalar_select %p1257_p9, 1, 0 }
  0x17   : > { %p1262_p11 = pnand %p696_p8, %p158_p10  ;;  %s1139_s8 = smov [#allocation6]  }
  0x18   : > { %1466 = sst [smem:[#allocation14_spill]] %s1465_s6  ;;  %s170_s9 = sshll.u32 %s1139_s8, 4  ;;  %s171_s9 = int_to_ptr.vmem [resolvable:$true] %s170_s9 }
  0x19   : > { %p827_p12 = pneg %p1262_p11  ;;  %s970_s10 = scalar_lea.vmem %s171_s9, 2048 }
  0x1a   : > { %p971_p2 = scmp.ne.s32.totalorder %s171_s9, %s970_s10  ;;  %p978_p6 = scmp.lt.s32.totalorder %s171_s9, %s171_s9 }
  0x1b   : > { %p828_p13 = pnand %p827_p12, %p1237_p1  ;;  %p979_p9 = scmp.lt.s32.totalorder %s970_s10, %s970_s10 }
  0x1d   : > { %p961_p0 = pneg %p828_p13  ;;  %p980_p7 = por %p979_p9, %p978_p6 }
  0x1f   : > { %p973_p4 = pnand %p971_p2, %p961_p0 }
  0x21   : > { %p974_p5 = pneg %p973_p4 }
  0x23   : > { %p981_p8 = pnand %p980_p7, %p974_p5 }
  0x25   : > { %984 = shalt.err (!%p981_p8)
}
  0x26   : > { %s1449_s11 = smov 128   ;;  %s1450_s12 = smov 8  }
  0x27   : > { %s1468_s2 = sld [smem:[#allocation17_spill]]  ;;  %s30_s18 = sadd.s32 1, %s1129_s23 }
  0x28   : > { %p31_p7 = scmp.ge.s32.totalorder %s30_s18, 4  ;;  %s33_s26 = sadd.s32 1, %s1133_s24 }
  0x29   : > { %s66_s27 = sadd.s32 1, %s1117_s20  ;;  %p73_p9 = scmp.ne.s32.totalorder %s1117_s20, %s1113_s19 }
  0x2a   : > { %s1495_s18 = smov (%p31_p7, %s30_s18), 0  ;;  %s1497_s26 = smov (!%p31_p7, %s33_s26), %s1133_s24 }
  0x2b   : > { %1469 = sst [smem:[#allocation15_spill]] %s1495_s18  ;;  %s63_s8 = ssub.s32 %s1129_s23, %s1495_s18 }
  0x2c   : > { %p74_p10 = scmp.eq.s32.totalorder %s1137_s25, 0  ;;  %p35_p12 = scmp.ge.s32.totalorder %s1497_s26, 2 }
  0x2d   : > { %830 = dma.hbm_to_vmem [thread:$0]  (!%p828_p13), %s1468_s2, 2048, %s171_s9, [#allocation7], %s1449_s11, %s1449_s11, %s1450_s12  }
  0x2e   : > { %p64_p0 = scmp.eq.s32.totalorder %s63_s8, 0  ;;  %p1287_p2 = por %p74_p10, %p73_p9 }
  0x2f   : > { %p840_p13 = scmp.lt.s32.totalorder %s1137_s25, 8  ;;  %s1499_s26 = smov (%p35_p12, %s1497_s26), 0 }
  0x30   : > { %1471 = sst [smem:[#allocation16_spill]] %s1499_s26  ;;  %s131_s13 = ssub.s32 %s1133_s24, %s1499_s26 }
  0x31   : > { %s1295_s10 = scalar_select %p64_p0, %s1117_s20, %s66_s27  }
  0x32   : > { %s194_s14 = sand.u32 1, %s1117_s20   ;;  %p132_p4 = scmp.eq.s32.totalorder %s131_s13, 0 }
  0x33   : > { %s699_s11 = sshll.u32 %s194_s14, 8  ;;  %s731_s12 = sshll.u32 %s1129_s23, 12 }
  0x34   : > { %s1304_s2 = scalar_select %p132_p4, %s1105_s17, %s134_s29  }
  0x35   : > { %s204_s6 = scalar_lea.hbm %s1444_s1, %s731_s12  ;;  %s198_s15 = scalar_lea.vmem [#allocation3], %s699_s11 }
  0x36   : > { %s205_s4 = sshll.u32 %s198_s15, 4  ;;  %p1311_p5 = pnand %p840_p13, %p1287_p2  ;;  %s206_s4 = int_to_ptr.vmem [resolvable:$true] %s205_s4 }
  0x37   : > { %s195_s27 = scalar_lea.sflag [#allocation4], %s194_s14  ;;  %s998_s13 = scalar_lea.vmem %s206_s4, 4096 }
  0x38   : > { %p987_p6 = pneg %p1311_p5  ;;  %p999_p8 = scmp.ne.s32.totalorder %s206_s4, %s998_s13 }
  0x39   : > { %s1142_s29 = smov [#allocation3]  }
  0x3a   : > { %p1001_p7 = pnand %p999_p8, %p987_p6  ;;  %s1003_s26 = sshll.u32 %s1142_s29, 4  ;;  %s1004_s26 = int_to_ptr.vmem [resolvable:$false] %s1003_s26 }
  0x3b   : > { %s1005_s12 = scalar_lea.vmem %s1004_s26, 8192  ;;  %p1006_p10 = scmp.lt.s32.totalorder %s206_s4, %s1004_s26 }
  0x3c   : > { %p1002_p9 = pneg %p1001_p7  ;;  %p1007_p12 = scmp.lt.s32.totalorder %s1005_s12, %s998_s13 }
  0x3e   : > { %p1008_p0 = por %p1007_p12, %p1006_p10 }
  0x40   : > { %p1009_p2 = pnand %p1008_p0, %p1002_p9 }
  0x42   : > { %1012 = shalt.err (!%p1009_p2)
}
  0x43   : > { %s1473_s15 = smov 8   ;;  %s1474_s11 = smov 128  }
  0x44   : > { %834 = dma.hbm_to_vmem [thread:$0]  (!%p1311_p5), %s204_s6, 4096, %s206_s4, %s195_s27, %s1474_s11, %s1474_s11, %s1473_s15  }
  0x45   : > { %217 = sbr.rel (%p1262_p11) target bundleno = 1005 (0x3ed), region = 36  ;;  %s219_s18 = sand.u32 (!%p1262_p11), 1, %s1113_s19  }
  0x46   : > { %s703_s9 = sshll.u32 (!%p1262_p11), %s219_s18, 8  ;;  %s220_s14 = scalar_lea.sflag (!%p1262_p11), [#allocation4], %s219_s18 }
  0x47   : > { %s1325_s8 = scalar_lea.vmem (!%p1262_p11), [#allocation3], %s703_s9 }
  0x4a   : > { %1084 = dma.done.wait (%p1246_p3), %s220_s14, 4096  }
  0x4b   : > { %1086 = vsyncadd (%p1246_p3), %s220_s14, 4294963200 }
  0x4c   : > { %1088 = dma.done.wait (%p1237_p1), [#allocation7], 2048  }
  0x4d   : > { %1090 = vsyncadd (%p1237_p1), [#allocation7], 4294965248  ;;  %s253_s4 = sand.u32 1, %s1101_s16   ;;  %p256_p11 = scmp.lt.s32.totalorder %s1125_s22, 1 }
  0x4e   : > { %s1339_s25 = sshll.u32 %s253_s4, 3  ;;  %p707_p3 = scmp.ne.s32.totalorder %s1121_s21, 0 }
  0x4f   : > { %s257_s6 = scalar_select %p256_p11, %s1125_s22, 1 }
  0x50   : > { %s255_s13 = scalar_lea.vmem [#allocation8], %s1339_s25  ;;  %264 = sbr.rel (%p707_p3) target bundleno = 87 (0x57), region = 48 }
  0x51   : > { %s706_s7 = sshll.u32 %s257_s6, 3 }
  0x52   : > { %s259_s27 = scalar_lea.vmem %s1443_s0, %s706_s7 }
  0x55   : > { %v1143_v0 = vmov 0.0  }
  0x56   : > { %265 = vst [vmem:[#allocation2] sm:$0xff] %v1143_v0 }
  0x57 PF: > { %v266_v1 = vld [vmem:[%s259_s27] sm:$0xff]  ;;  %v1144_v3 = vmov 2   ;;  %v1145_v4 = vmov 0   ;;  %v393_v6 = vld [vmem:[%s1325_s8 + $0xf0] sm:$0xff]  ;;  %v1146_v8 = vmov 3   ;;  %v1147_v9 = vmov 1  }
  0x58   : > { %v394_v2 = vld [vmem:[%s1325_s8 + $0xf8] sm:$0xff]  ;;  %948 = vset.pattern.permute.xlu1 %v1144_v3  ;;  %946 = vset.pattern.permute.xlu0 %v1145_v4  ;;  %v377_v7 = vld [vmem:[%s1325_s8 + $0x70] sm:$0xff]  ;;  %v392_v10 = vld [vmem:[%s1325_s8 + $0xe8] sm:$0xff]  ;;  %v1148_v13 = vmov 4   ;;  %v1149_v14 = vmov 5   ;;  %v1150_v20 = vmov 6   ;;  %v268_v42 = vlaneseq }
  0x59   : > { %v378_v5 = vld [vmem:[%s1325_s8 + $0x78] sm:$0xff]  ;;  %297 = vperm.xlu1 %948, %v266_v1   ;;  %275 = vperm.xlu0 %946, %v266_v1   ;;  %v376_v11 = vld [vmem:[%s1325_s8 + $0x68] sm:$0xff]  ;;  %v391_v12 = vld [vmem:[%s1325_s8 + $0xe0] sm:$0xff]  ;;  %v1151_v24 = vmov 7   ;;  %s708_s28 = sshll.u32 %s1121_s21, 8  ;;  %v1152_v52 = vmov 0.0  }
  0x5a   : > { %732 = vmatprep.subr.mxu0 %v394_v2  ;;  %v375_v15 = vld [vmem:[%s1325_s8 + $0x60] sm:$0xff]  ;;  %v390_v16 = vld [vmem:[%s1325_s8 + $0xd8] sm:$0xff]  ;;  %v389_v18 = vld [vmem:[%s1325_s8 + $0xd0] sm:$0xff]  ;;  %v269_v43 = vand.u32 127, %v268_v42  ;;  %v271_v45 = vstv %s708_s28  ;;  %p725_p1 = scmp.ne.s32.totalorder %s1121_s21, 3 }
  0x5b   : > { %733 = vmatpush3.msra.mxu0 %v378_v5  ;;  %v374_v17 = vld [vmem:[%s1325_s8 + $0x58] sm:$0xff]  ;;  %v373_v19 = vld [vmem:[%s1325_s8 + $0x50] sm:$0xff]  ;;  %v388_v21 = vld [vmem:[%s1325_s8 + $0xc8] sm:$0xff] }
  0x5c   : > { %734 = vmatprep.subr.mxu0 %v393_v6  ;;  %v372_v22 = vld [vmem:[%s1325_s8 + $0x48] sm:$0xff]  ;;  %v387_v23 = vld [vmem:[%s1325_s8 + $0xc0] sm:$0xff]  ;;  %v386_v26 = vld [vmem:[%s1325_s8 + $0xb8] sm:$0xff]  ;;  %v270_v44 = vadd.s32 128, %v269_v43  ;;  %v272_v48 = vadd.s32 %v271_v45, %v269_v43 }
  0x5d   : > { %949 = vset.pattern.permute.xlu1 %v1146_v8  ;;  %947 = vset.pattern.permute.xlu0 %v1147_v9  ;;  %v371_v25 = vld [vmem:[%s1325_s8 + $0x40] sm:$0xff]  ;;  %v370_v27 = vld [vmem:[%s1325_s8 + $0x38] sm:$0xff]  ;;  %v385_v28 = vld [vmem:[%s1325_s8 + $0xb0] sm:$0xff] }
  0x5e   : > { %308 = vperm.xlu1 %949, %v266_v1   ;;  %286 = vperm.xlu0 %947, %v266_v1   ;;  %v369_v29 = vld [vmem:[%s1325_s8 + $0x30] sm:$0xff]  ;;  %v384_v30 = vld [vmem:[%s1325_s8 + $0xa8] sm:$0xff]  ;;  %v383_v32 = vld [vmem:[%s1325_s8 + $0xa0] sm:$0xff]  ;;  %v273_v49 = vadd.s32 %v271_v45, %v270_v44 }
  0x5f   : > { %735 = vmatpush3.msra.mxu0 %v377_v7  ;;  %v368_v31 = vld [vmem:[%s1325_s8 + $0x28] sm:$0xff]  ;;  %v367_v33 = vld [vmem:[%s1325_s8 + $0x20] sm:$0xff]  ;;  %v382_v34 = vld [vmem:[%s1325_s8 + $0x98] sm:$0xff] }
  0x60   : > { %736 = vmatprep.subr.mxu0 %v392_v10  ;;  %v366_v35 = vld [vmem:[%s1325_s8 + $0x18] sm:$0xff]  ;;  %v381_v36 = vld [vmem:[%s1325_s8 + $0x90] sm:$0xff]  ;;  %v380_v38 = vld [vmem:[%s1325_s8 + $0x88] sm:$0xff] }
  0x61   : > { %737 = vmatpush3.msra.mxu0 %v376_v11  ;;  %v365_v37 = vld [vmem:[%s1325_s8 + $0x10] sm:$0xff]  ;;  %v364_v39 = vld [vmem:[%s1325_s8 + $0x8] sm:$0xff]  ;;  %v379_v40 = vld [vmem:[%s1325_s8 + $0x80] sm:$0xff] }
  0x62   : > { %950 = vset.pattern.permute.xlu1 %v1148_v13  ;;  %951 = vset.pattern.permute.xlu0 %v1149_v14  ;;  %v363_v41 = vld [vmem:[%s1325_s8] sm:$0xff] }
  0x63   : > { %319 = vperm.xlu1 %950, %v266_v1   ;;  %330 = vperm.xlu0 %951, %v266_v1  }
  0x64   : > { %738 = vmatprep.subr.mxu0 %v391_v12 }
  0x65   : > { %739 = vmatpush3.msra.mxu0 %v375_v15 }
  0x66   : > { %740 = vmatprep.subr.mxu0 %v390_v16 }
  0x67   : > { %952 = vset.pattern.permute.xlu1 %v1150_v20  ;;  %741 = vmatpush3.msra.mxu0 %v374_v17 }
  0x68   : > { %341 = vperm.xlu1 %952, %v266_v1   ;;  %742 = vmatprep.subr.mxu0 %v389_v18 }
  0x69   : > { %743 = vmatpush3.msra.mxu0 %v373_v19  ;;  %954 = vset.pattern.permute.xlu0 %v1151_v24 }
  0x6a   : > { %744 = vmatprep.subr.mxu0 %v388_v21 }
  0x6b   : > { %745 = vmatpush3.msra.mxu0 %v372_v22 }
  0x6c   : > { %953 = vset.pattern.permute.xlu1 %v1151_v24  ;;  %746 = vmatprep.subr.mxu0 %v387_v23  ;;  %v362_v24 = vld [vmem:[#allocation2] sm:$0xff] }
  0x6d   : > { %352 = vperm.xlu1 %953, %v266_v1   ;;  %747 = vmatpush3.msra.mxu0 %v371_v25 }
  0x6e   : > { %748 = vmatprep.subr.mxu0 %v386_v26 }
  0x6f   : > { %749 = vmatpush3.msra.mxu0 %v370_v27 }
  0x70   : > { %750 = vmatprep.subr.mxu0 %v385_v28 }
  0x71   : > { %751 = vmatpush3.msra.mxu0 %v369_v29 }
  0x72   : > { %752 = vmatprep.subr.mxu0 %v384_v30 }
  0x73   : > { %753 = vmatpush3.msra.mxu0 %v368_v31 }
  0x74   : > { %754 = vmatprep.subr.mxu0 %v383_v32 }
  0x75   : > { %755 = vmatpush3.msra.mxu0 %v367_v33 }
  0x76   : > { %756 = vmatprep.subr.mxu0 %v382_v34 }
  0x77   : > { %757 = vmatpush3.msra.mxu0 %v366_v35 }
  0x78   : > { %758 = vmatprep.subr.mxu0 %v381_v36 }
  0x79   : > { %759 = vmatpush3.msra.mxu0 %v365_v37 }
  0x7a   : > { %760 = vmatprep.subr.mxu0 %v380_v38 }
  0x7b   : > { %761 = vmatpush3.msra.mxu0 %v364_v39 }
  0x7c   : > { %762 = vmatprep.subr.mxu0 %v379_v40 }
  0x7d   : > { %763 = vmatpush3.msra.mxu0 %v363_v41 }
  0xd4   : > { %v298_v46 = vpop.permute.xlu1 %297  ;;  %v276_v47 = vpop.permute.xlu0 %275 }
  0xd5   : > { %vm277_vm0 = vcmp.eq.s32.totalorder %v272_v48, %v276_v47  ;;  %vm278_vm1 = vcmp.eq.s32.totalorder %v273_v49, %v276_v47  ;;  %vm299_vm2 = vcmp.eq.s32.totalorder %v272_v48, %v298_v46  ;;  %vm300_vm3 = vcmp.eq.s32.totalorder %v273_v49, %v298_v46 }
  0xd6   : > { %v709_v53 = vsel %vm277_vm0, 1.0, %v1152_v52  ;;  %v710_v54 = vsel %vm278_vm1, 1.0, %v1152_v52  ;;  %v713_v59 = vsel %vm299_vm2, 1.0, %v1152_v52  ;;  %v714_v60 = vsel %vm300_vm3, 1.0, %v1152_v52 }
  0xd9   : > { %v309_v50 = vpop.permute.xlu1 %308  ;;  %v287_v51 = vpop.permute.xlu0 %286 }
  0xda   : > { %vm288_vm4 = vcmp.eq.s32.totalorder %v272_v48, %v287_v51  ;;  %vm289_vm5 = vcmp.eq.s32.totalorder %v273_v49, %v287_v51  ;;  %vm310_vm6 = vcmp.eq.s32.totalorder %v272_v48, %v309_v50  ;;  %vm311_vm7 = vcmp.eq.s32.totalorder %v273_v49, %v309_v50 }
  0xdb   : > { %v711_v55 = vsel %vm288_vm4, 1.0, %v1152_v52  ;;  %v712_v56 = vsel %vm289_vm5, 1.0, %v1152_v52  ;;  %v715_v61 = vsel %vm310_vm6, 1.0, %v1152_v52  ;;  %v716_v62 = vsel %vm311_vm7, 1.0, %v1152_v52 }
  0xdc   : > { %v294_v57 = vadd.f32 %v711_v55, %v709_v53  ;;  %v295_v58 = vadd.f32 %v712_v56, %v710_v54 }
  0xde   : > { %v305_v63 = vadd.f32 %v713_v59, %v294_v57  ;;  %v306_v0 = vadd.f32 %v714_v60, %v295_v58  ;;  %v320_v1 = vpop.permute.xlu1 %319  ;;  %v331_v2 = vpop.permute.xlu0 %330 }
  0xdf   : > { %vm321_vm8 = vcmp.eq.s32.totalorder %v272_v48, %v320_v1  ;;  %vm322_vm9 = vcmp.eq.s32.totalorder %v273_v49, %v320_v1  ;;  %vm332_vm10 = vcmp.eq.s32.totalorder %v272_v48, %v331_v2  ;;  %vm333_vm11 = vcmp.eq.s32.totalorder %v273_v49, %v331_v2 }
  0xe0   : > { %v316_v3 = vadd.f32 %v715_v61, %v305_v63  ;;  %v317_v4 = vadd.f32 %v716_v62, %v306_v0  ;;  %v717_v5 = vsel %vm321_vm8, 1.0, %v1152_v52  ;;  %v718_v6 = vsel %vm322_vm9, 1.0, %v1152_v52 }
  0xe1   : > { %v719_v9 = vsel %vm332_vm10, 1.0, %v1152_v52  ;;  %v720_v10 = vsel %vm333_vm11, 1.0, %v1152_v52 }
  0xe2   : > { %v327_v7 = vadd.f32 %v717_v5, %v316_v3  ;;  %v328_v8 = vadd.f32 %v718_v6, %v317_v4 }
  0xe3   : > { %v342_v11 = vpop.permute.xlu1 %341 }
  0xe4   : > { %vm343_vm12 = vcmp.eq.s32.totalorder %v272_v48, %v342_v11  ;;  %vm344_vm13 = vcmp.eq.s32.totalorder %v273_v49, %v342_v11  ;;  %v338_v12 = vadd.f32 %v719_v9, %v327_v7  ;;  %v339_v13 = vadd.f32 %v720_v10, %v328_v8 }
  0xe5   : > { %v721_v14 = vsel %vm343_vm12, 1.0, %v1152_v52  ;;  %v722_v15 = vsel %vm344_vm13, 1.0, %v1152_v52 }
  0xe6   : > { %v349_v17 = vadd.f32 %v721_v14, %v338_v12  ;;  %v350_v18 = vadd.f32 %v722_v15, %v339_v13 }
  0xe8   : > { %v353_v16 = vpop.permute.xlu1 %352 }
  0xe9   : > { %vm354_vm14 = vcmp.eq.s32.totalorder %v272_v48, %v353_v16  ;;  %vm355_vm15 = vcmp.eq.s32.totalorder %v273_v49, %v353_v16 }
  0xea   : > { %v723_v19 = vsel %vm354_vm14, 1.0, %v1152_v52  ;;  %v724_v20 = vsel %vm355_vm15, 1.0, %v1152_v52 }
  0xeb   : > { %v360_v21 = vadd.f32 %v723_v19, %v349_v17  ;;  %v361_v22 = vadd.f32 %v724_v20, %v350_v18 }
  0xed   : > { %459 = vmatprep.mubr.f32.mxu0 %v361_v22 }
  0xee   : > { %460 = vmatmul.mubr.f32.vlgmr.msra.gmra.mxu0 %v360_v21 }
 0x1ae   : > { %v764_v23 = vpop.f32.mrf.mxu0 }
 0x1b0   : > { %v765_v25 = vpop.f32.mrf.mxu0 }
 0x1b1   : > { %v766_v26 = vadd.f32 %v765_v25, %v764_v23  ;;  %470 = sbr.rel (%p725_p1) target bundleno = 979 (0x3d3), region = 52 }
 0x1b3   : > { %v465_v27 = vadd.f32 %v766_v26, %v362_v24 }
 0x1b5   : > { %466 = vst [vmem:[#allocation2] sm:$0xff] %v465_v27 }
 0x1b6   : > { %v488_v28 = vld [vmem:[#allocation6 + $0x78] sm:$0xff]  ;;  %v1153_v29 = vmov 0.0   ;;  %v487_v30 = vld [vmem:[#allocation6 + $0x70] sm:$0xff]  ;;  %vm1154_vm0 = vmmov 0   ;;  %v486_v31 = vld [vmem:[#allocation6 + $0x68] sm:$0xff] }
 0x1b7   : > { %784 = vmatprep.subr.mxu0 %v1153_v29  ;;  %816 = vmatprep.mubr.msk.f32.mxu0 %vm1154_vm0, %v1153_v29  ;;  %v485_v32 = vld [vmem:[#allocation6 + $0x60] sm:$0xff]  ;;  %v484_v33 = vld [vmem:[#allocation6 + $0x58] sm:$0xff]  ;;  %v483_v34 = vld [vmem:[#allocation6 + $0x50] sm:$0xff] }
 0x1b8   : > { %785 = vmatpush3.msra.mxu0 %v488_v28  ;;  %v482_v35 = vld [vmem:[#allocation6 + $0x48] sm:$0xff]  ;;  %v481_v36 = vld [vmem:[#allocation6 + $0x40] sm:$0xff]  ;;  %v480_v37 = vld [vmem:[#allocation6 + $0x38] sm:$0xff] }
 0x1b9   : > { %786 = vmatprep.subr.mxu0 %v1153_v29  ;;  %v479_v38 = vld [vmem:[#allocation6 + $0x30] sm:$0xff]  ;;  %v478_v39 = vld [vmem:[#allocation6 + $0x28] sm:$0xff]  ;;  %v477_v40 = vld [vmem:[#allocation6 + $0x20] sm:$0xff] }
 0x1ba   : > { %787 = vmatpush3.msra.mxu0 %v487_v30  ;;  %v476_v41 = vld [vmem:[#allocation6 + $0x18] sm:$0xff]  ;;  %v475_v42 = vld [vmem:[#allocation6 + $0x10] sm:$0xff]  ;;  %v474_v44 = vld [vmem:[#allocation6 + $0x8] sm:$0xff] }
 0x1bb   : > { %788 = vmatprep.subr.mxu0 %v1153_v29  ;;  %v473_v45 = vld [vmem:[#allocation6] sm:$0xff]  ;;  %v726_v47 = vld [vmem:[%s1446_s3] ss:$0 sm:$0xff] }
 0x1bc   : > { %789 = vmatpush3.msra.mxu0 %v486_v31  ;;  %v471_v43 = vld [vmem:[#allocation2] sm:$0xff] }
 0x1bd   : > { %790 = vmatprep.subr.mxu0 %v1153_v29  ;;  %v472_v46 = vmul.f32 0.125, %v471_v43 }
 0x1be   : > { %791 = vmatpush3.msra.mxu0 %v485_v32 }
 0x1bf   : > { %792 = vmatprep.subr.mxu0 %v1153_v29 }
 0x1c0   : > { %793 = vmatpush3.msra.mxu0 %v484_v33 }
 0x1c1   : > { %794 = vmatprep.subr.mxu0 %v1153_v29 }
 0x1c2   : > { %795 = vmatpush3.msra.mxu0 %v483_v34 }
 0x1c3   : > { %796 = vmatprep.subr.mxu0 %v1153_v29 }
 0x1c4   : > { %797 = vmatpush3.msra.mxu0 %v482_v35 }
 0x1c5   : > { %798 = vmatprep.subr.mxu0 %v1153_v29 }
 0x1c6   : > { %799 = vmatpush3.msra.mxu0 %v481_v36 }
 0x1c7   : > { %800 = vmatprep.subr.mxu0 %v1153_v29 }
 0x1c8   : > { %801 = vmatpush3.msra.mxu0 %v480_v37 }
 0x1c9   : > { %802 = vmatprep.subr.mxu0 %v1153_v29 }
 0x1ca   : > { %803 = vmatpush3.msra.mxu0 %v479_v38 }
 0x1cb   : > { %804 = vmatprep.subr.mxu0 %v1153_v29 }
 0x1cc   : > { %805 = vmatpush3.msra.mxu0 %v478_v39 }
 0x1cd   : > { %806 = vmatprep.subr.mxu0 %v1153_v29 }
 0x1ce   : > { %807 = vmatpush3.msra.mxu0 %v477_v40 }
 0x1cf   : > { %808 = vmatprep.subr.mxu0 %v1153_v29 }
 0x1d0   : > { %809 = vmatpush3.msra.mxu0 %v476_v41 }
 0x1d1   : > { %810 = vmatprep.subr.mxu0 %v1153_v29 }
 0x1d2   : > { %811 = vmatpush3.msra.mxu0 %v475_v42 }
 0x1d3   : > { %812 = vmatprep.subr.mxu0 %v1153_v29 }
 0x1d4   : > { %813 = vmatpush3.msra.mxu0 %v474_v44 }
 0x1d5   : > { %814 = vmatprep.subr.mxu0 %v1153_v29 }
 0x1d6   : > { %815 = vmatpush3.msra.mxu0 %v473_v45 }
 0x1d7   : > { %817 = vmatmul.mubr.f32.vlgmr.msra.gmra.mxu0 %v472_v46 }
 0x297   : > { %v562_v48 = vpop.f32.mrf.mxu0 }
 0x298   : > { %v563_v49 = vadd.f32 %v726_v47, %v562_v48 }
 0x299   : > { %v818_v50 = vpop.f32.mrf.mxu0 }
 0x29a   : > { %566 = vmax.xlane.f32.xlu0 %v563_v49 }
 0x323   : > { %v567_v51 = vpop.xlane.xlu0 %566 }
 0x324   : > { %v568_v52 = vsub.f32 %v563_v49, %v567_v51 }
 0x326   : > { %v569_v53 = vmul.f32 1.442695, %v568_v52 }
 0x328   : > { %955 = vpow2.f32 %v569_v53 }
 0x335   : > { %v956_v54 = vpop.eup %955 }
 0x336   : > { %571 = vadd.xlane.f32.xlu0 %v956_v54 }
 0x3bf   : > { %v572_v55 = vpop.xlane.xlu0 %571 }
 0x3c0   : > { %957 = vlog2.f32 %v572_v55 }
 0x3cd   : > { %v958_v56 = vpop.eup %957 }
 0x3ce   : > { %v574_v57 = vmul.f32 0.6931472, %v958_v56 }
 0x3d0   : > { %v575_v58 = vsub.f32 %v568_v52, %v574_v57 }
 0x3d2   : > { %576 = vst [vmem:[%s255_s13] sm:$0xff] %v575_v58 }
 0x3d3 PF: > { %s728_s12 = sshll.u32 %s1125_s22, 7  ;;  %s1475_s18 = sld [smem:[#allocation18_spill]] }
 0x3d4   : > { %s591_s8 = sshll.u32 %s255_s13, 4  ;;  %s578_s6 = scalar_lea.sflag [#allocation5], %s253_s4  ;;  %s592_s8 = int_to_ptr.vmem [resolvable:$true] %s591_s8 }
 0x3d5   : > { %s1013_s7 = scalar_lea.vmem %s592_s8, 128  ;;  %p1477_p4 = scmp.ne.s32.totalorder %s1464_s5, 0 }
 0x3d6   : > { %p1014_p13 = scmp.ne.s32.totalorder %s592_s8, %s1013_s7  ;;  %s1155_s30 = smov [#allocation8]  }
 0x3d7   : > { %s1017_s26 = sshll.u32 %s1155_s30, 4  ;;  %s1018_s26 = int_to_ptr.vmem [resolvable:$false] %s1017_s26 }
 0x3d8   : > { %p1015_p5 = pnand %p1014_p13, %p1477_p4  ;;  %s1019_s27 = scalar_lea.vmem %s1018_s26, 256 }
 0x3d9   : > { %s1476_s9 = smov %s1475_s18  ;;  %s589_s14 = scalar_lea.hbm %s1475_s18, %s728_s12 }
 0x3da   : > { %p1016_p6 = pneg %p1015_p5  ;;  %p1020_p8 = scmp.lt.s32.totalorder %s592_s8, %s1018_s26 }
 0x3db   : > { %p1021_p7 = scmp.lt.s32.totalorder %s1019_s27, %s1013_s7 }
 0x3dd   : > { %p1022_p9 = por %p1021_p7, %p1020_p8 }
 0x3df   : > { %p1023_p10 = pnand %p1022_p9, %p1016_p6 }
 0x3e1   : > { %1026 = shalt.err (!%p1023_p10)
}
 0x3e2   : > { %s1027_s22 = scalar_lea.hbm %s589_s14, 128  ;;  %s1031_s13 = scalar_lea.hbm %s1476_s9, 256 }
 0x3e3   : > { %p1028_p12 = scmp.ne.s32.totalorder %s589_s14, %s1027_s22  ;;  %p1032_p11 = scmp.lt.s32.totalorder %s589_s14, %s1476_s9 }
 0x3e4   : > { %p1033_p3 = scmp.lt.s32.totalorder %s1031_s13, %s1027_s22 }
 0x3e5   : > { %p1029_p0 = pnand %p1028_p12, %p1477_p4 }
 0x3e6   : > { %p1034_p1 = por %p1033_p3, %p1032_p11 }
 0x3e7   : > { %p1030_p2 = pneg %p1029_p0 }
 0x3e9   : > { %p1035_p13 = pnand %p1034_p1, %p1030_p2 }
 0x3eb   : > { %1038 = shalt.err (!%p1035_p13)
}
 0x3ec   : > { %825 = dma.vmem_to_hbm [thread:$0]  (%p1477_p4), %s592_s8, 128, %s589_s14, %s578_s6  }
 0x3ed PF: > { %s1478_s29 = sld [smem:[#allocation13_spill]] }
 0x3ee   : > { %s1479_s12 = sld [smem:[#allocation12_spill]] }
 0x3ef   : > { %s1480_s15 = sld [smem:[#allocation14_spill]] }
 0x3f3   : > { %p842_p5 = scmp.ge.s32.totalorder %s1478_s29, 2 }
 0x3f4   : > { %s603_s11 = sand.u32 1, %s1479_s12  }
 0x3f5   : > { %p1481_p6 = scmp.ne.s32.totalorder %s1480_s15, 0  ;;  %s604_s18 = scalar_lea.sflag [#allocation5], %s603_s11 }
 0x3f7   : > { %p836_p8 = pnand %p842_p5, %p1481_p6 }
 0x3f9   : > { %p837_p7 = pneg %p836_p8 }
 0x3fb   : > { %1092 = dma.done.wait (%p837_p7), %s604_s18, 128  }
 0x3fc   : > { %1094 = vsyncadd (%p837_p7), %s604_s18, 4294967168  ;;  %s21_s25 = sadd.s32 1, %s1478_s29   ;;  %s1482_s5 = sld [smem:[#allocation15_spill]] }
 0x3fd   : > { %p18_p9 = scmp.ge.s32.totalorder %s21_s25, 10   ;;  %s1483_s14 = sld [smem:[#allocation16_spill]] }
 0x3fe   : > { %s1484_s15 = smov %s1101_s16  ;;  %s1485_s16 = smov %s1105_s17 }
 0x3ff   : > { %s1486_s17 = smov %s1304_s2  ;;  %s1487_s18 = smov %s1113_s19 }
 0x400   : > { %s1488_s19 = smov %s1117_s20  ;;  %s1489_s20 = smov %s1295_s10 }
 0x401   : > { %s1490_s21 = smov %s1129_s23  ;;  %s1491_s22 = smov %s1133_s24 }
 0x402   : > { %s1492_s23 = smov %s1482_s5  ;;  %20 = sbr.rel (!%p18_p9) target bundleno = 13 (0xd), region = 96 }
 0x403   : > { %s1493_s24 = smov %s1483_s14 }
 0x407   :  { %609 = vsyncpa [#allocation4], 1 }
 0x408   :  { %611 = vsyncpa [#allocation4 + $0x1], 1 }
 0x409   :  { %612 = vsyncpa [#allocation7], 1 }
 0x40a   :  { %613 = vsyncpa [#allocation5], 1 }
 0x40b   :  { %615 = vsyncpa [#allocation5 + $0x1], 1 }

</bundles_post_ra>
